<compile_context>
chip_gen: v7x
topology: tpu7x:2x2x1
jax: 0.10.0
libtpu: 0.0.40
codegen_flags: <defaults>
</compile_context>

<pallas_src>
import functools

import jax
import jax.numpy as jnp
from jax import lax
from jax.experimental import pallas as pl
from jax.experimental.pallas import tpu as pltpu

_BIG = 1e30          # finite "infinity" for hardest-negative mining (squared)
_PAD_LABEL = -1e9    # sentinel label for padded columns (never equals a real label)


def _round_up(x, m):
    return ((x + m - 1) // m) * m


# ----------------------------------------------------------------------------
# choose_align (plain-JAX glue, matches the torch helper exactly)
# ----------------------------------------------------------------------------
def choose_align(type_id, n, b):
    if type_id == 0:
        return jnp.tile(jnp.arange(n, dtype=jnp.float32), b)
    elif type_id == 1:
        return jnp.tile(
            jnp.arange(-n // 2, n // 2, dtype=jnp.float32) / (n // 2), b)
    else:
        m = n * b
        return jnp.arange(-m // 2, m // 2, dtype=jnp.float32) / (m // 2)


# ----------------------------------------------------------------------------
# Pallas kernel: batch-hard triplet mining (streaming max/min on dist^2)
# ----------------------------------------------------------------------------
def _triplet_kernel(xq_ref, xkt_ref, sqq_ref, sqk_ref, labq_ref, labk_ref,
                    valid_ref, out_ref, hp_ref, hn_ref, *, margin):
    qi = pl.program_id(0)
    ki = pl.program_id(1)
    tq = xq_ref.shape[0]
    tk = valid_ref.shape[1]

    @pl.when(ki == 0)
    def _():
        hp_ref[...] = jnp.zeros_like(hp_ref)
        hn_ref[...] = jnp.full_like(hn_ref, _BIG)

    # Gram block on the MXU: bf16 operands, f32 accumulation.  RHS arrives
    # pre-transposed (C, TK) -> natural (M,K)x(K,N), no in-kernel transpose.
    g = lax.dot_general(xq_ref[...], xkt_ref[...],
                        (((1,), (0,)), ((), ())),
                        preferred_element_type=jnp.float32)        # (TQ, TK)

    # Squared pairwise distances; per-row norms precomputed in the wrapper.
    dist2 = jnp.maximum(sqq_ref[...] - 2.0 * g + sqk_ref[...], 0.0)

    labels_eq = labq_ref[...] == labk_ref[...]                     # (TQ, TK)
    valid = valid_ref[...] > 0.5                                   # (1, TK)

    # Positives: same label (padded columns carry a sentinel label so they
    # never match).  Negatives: different label AND a real (non-pad) column.
    # Mining on dist^2; sqrt deferred to the finalize (monotonic).
    pos_d2 = jnp.where(labels_eq, dist2, 0.0)
    neg_d2 = jnp.where(jnp.logical_and(jnp.logical_not(labels_eq), valid),
                       dist2, _BIG)

    hn_ref[...] = jnp.minimum(hn_ref[...],
                              jnp.min(neg_d2, axis=1, keepdims=True))

    # Self-pair (diagonal) exclusion only on tiles that contain the diagonal.
    overlap = jnp.logical_and(ki * tk < (qi + 1) * tq,
                              qi * tq < (ki + 1) * tk)

    @pl.when(overlap)
    def _():
        row_g = qi * tq + lax.broadcasted_iota(jnp.int32, (tq, tk), 0)
        col_g = ki * tk + lax.broadcasted_iota(jnp.int32, (tq, tk), 1)
        pd = jnp.where(row_g != col_g, pos_d2, 0.0)
        hp_ref[...] = jnp.maximum(hp_ref[...],
                                  jnp.max(pd, axis=1, keepdims=True))

    @pl.when(jnp.logical_not(overlap))
    def _():
        hp_ref[...] = jnp.maximum(hp_ref[...],
                                  jnp.max(pos_d2, axis=1, keepdims=True))

    @pl.when(ki == pl.num_programs(1) - 1)
    def _():
        hp = jnp.sqrt(hp_ref[...])          # no positive -> 0
        hn = jnp.sqrt(hn_ref[...])          # no negative -> huge -> loss 0
        out_ref[...] = jnp.maximum(hp - hn + margin, 0.0)


def _choose_tiles(n):
    """Returns (n_pad, tq, tk).  >=2 q tiles for small N (v7x megacore)."""
    if n <= 512:
        n_pad = _round_up(n, 16)
        return n_pad, n_pad // 2, n_pad
    if n <= 2048:
        n_pad = _round_up(n, 256)
        return n_pad, 256, 256
    n_pad = _round_up(n, 512)
    return n_pad, 256, 512


def triplet_loss_hard(flat_feat, labels, margin):
    n, c = flat_feat.shape
    n_pad, tq, tk = _choose_tiles(n)
    pad = n_pad - n

    feat_f32 = flat_feat.astype(jnp.float32)
    lab = labels.astype(jnp.float32)
    valid = jnp.ones((n,), jnp.float32)
    if pad:
        feat_f32 = jnp.pad(feat_f32, ((0, pad), (0, 0)))
        lab = jnp.pad(lab, (0, pad), constant_values=_PAD_LABEL)
        valid = jnp.pad(valid, (0, pad))

    # Per-row squared norms once, in f32 (hoisted out of the kernel entirely).
    sq = jnp.sum(feat_f32 * feat_f32, axis=1)

    # bf16 operands for the MXU; RHS pre-transposed to (C, N).
    feat_q = feat_f32.astype(jnp.bfloat16)          # (n_pad, c)
    feat_kt = feat_q.T                              # (c, n_pad)

    sq_q = sq.reshape(n_pad, 1)
    sq_k = sq.reshape(1, n_pad)
    lab_q = lab.reshape(n_pad, 1)
    lab_k = lab.reshape(1, n_pad)
    valid_k = valid.reshape(1, n_pad)

    grid = (n_pad // tq, n_pad // tk)
    per_row = pl.pallas_call(
        functools.partial(_triplet_kernel, margin=float(margin)),
        out_shape=jax.ShapeDtypeStruct((n_pad, 1), jnp.float32),
        grid=grid,
        in_specs=[
            pl.BlockSpec((tq, c), lambda qi, ki: (qi, 0)),   # q rows (bf16)
            pl.BlockSpec((c, tk), lambda qi, ki: (0, ki)),   # k cols, pre-T (bf16)
            pl.BlockSpec((tq, 1), lambda qi, ki: (qi, 0)),   # ||q||^2
            pl.BlockSpec((1, tk), lambda qi, ki: (0, ki)),   # ||k||^2
            pl.BlockSpec((tq, 1), lambda qi, ki: (qi, 0)),   # labels (col)
            pl.BlockSpec((1, tk), lambda qi, ki: (0, ki)),   # labels (row)
            pl.BlockSpec((1, tk), lambda qi, ki: (0, ki)),   # valid mask
        ],
        out_specs=pl.BlockSpec((tq, 1), lambda qi, ki: (qi, 0)),
        scratch_shapes=[pltpu.VMEM((tq, 1), jnp.float32),    # hardest pos (d^2)
                        pltpu.VMEM((tq, 1), jnp.float32)],   # hardest neg (d^2)
        compiler_params=pltpu.CompilerParams(
            dimension_semantics=("parallel", "arbitrary")),
    )(feat_q, feat_kt, sq_q, sq_k, lab_q, lab_k, valid_k)

    # Mean over the real (unpadded) anchors.
    return jnp.sum(per_row[:n, 0]) / float(n)


# ----------------------------------------------------------------------------
# Pallas kernel: mean-reduction regression loss (MSE or L1), lane-dense slab
# ----------------------------------------------------------------------------
def _dr_kernel(pred_ref, label_ref, out_ref, acc_ref, *, l1, inv_count):
    @pl.when(pl.program_id(0) == 0)
    def _():
        acc_ref[...] = jnp.zeros_like(acc_ref)

    d = pred_ref[...].astype(jnp.float32) - label_ref[...].astype(jnp.float32)
    e = jnp.abs(d) if l1 else d * d
    # Lane-wide accumulator: per-step reduce over rows only.
    acc_ref[...] += jnp.sum(e, axis=0, keepdims=True)

    @pl.when(pl.program_id(0) == pl.num_programs(0) - 1)
    def _():
        out_ref[...] = jnp.sum(acc_ref[...], axis=1, keepdims=True) * inv_count


_DR_LANES = 128
_DR_BLOCK_ROWS = 4096   # 4096 * 128 * 4 B = 2 MiB / input / buffer


def dr_loss_call(pred, label, l1):
    # Lane-dense slab: flatten to 1-D, zero-pad to a multiple of 128 lanes.
    # Zero padding contributes 0 to both the MSE and L1 sums.
    p = pred.reshape(-1)
    l = label.reshape(-1)
    count = p.shape[0]

    total = _round_up(max(count, _DR_LANES), _DR_LANES)
    pad = total - count
    if pad:
        p = jnp.pad(p, (0, pad))
        l = jnp.pad(l, (0, pad))
    rows = total // _DR_LANES
    p2 = p.reshape(rows, _DR_LANES)
    l2 = l.reshape(rows, _DR_LANES)

    # Byte-capped row block (safe double-buffering on all TPU generations).
    if rows <= _DR_BLOCK_ROWS:
        block_r, grid_r = rows, 1
    else:
        block_r = _DR_BLOCK_ROWS
        grid_r = pl.cdiv(rows, block_r)
        pad_r = grid_r * block_r - rows
        if pad_r:
            p2 = jnp.pad(p2, ((0, pad_r), (0, 0)))
            l2 = jnp.pad(l2, ((0, pad_r), (0, 0)))

    out = pl.pallas_call(
        functools.partial(_dr_kernel, l1=bool(l1), inv_count=1.0 / float(count)),
        out_shape=jax.ShapeDtypeStruct((1, 1), jnp.float32),
        grid=(grid_r,),
        in_specs=[
            pl.BlockSpec((block_r, _DR_LANES), lambda i: (i, 0)),
            pl.BlockSpec((block_r, _DR_LANES), lambda i: (i, 0)),
        ],
        out_specs=pl.BlockSpec((1, 1), lambda i: (0, 0)),
        scratch_shapes=[pltpu.VMEM((1, _DR_LANES), jnp.float32)],
        compiler_params=pltpu.CompilerParams(
            dimension_semantics=("arbitrary",)),
    )(p2, l2)
    return out[0, 0]


# ----------------------------------------------------------------------------
# LossFun forward (glue mirrors the PyTorch control flow)
# ----------------------------------------------------------------------------
def loss_fun(pred, label, feat, *, alpha=1.0, margin=0.3,
             etf_head=False, loss_align=0):
    def _dr(p, l):
        return dr_loss_call(p, l, l1=etf_head)

    def _mse(p, l):
        return dr_loss_call(p, l, l1=False)

    if feat is not None:
        b, n, c = feat.shape
        flat_feat = feat.reshape(-1, c)
        la = choose_align(loss_align, n, b)
        t_loss = triplet_loss_hard(flat_feat, la, margin)
    else:
        alpha = 0.0
        t_loss = jnp.float32(0.0)

    # TODO(synk): multiple regression heads (list/dict) still launch one
    # pallas_call per tensor; a fused multi-slab reduction would amortize
    # launch overhead when there are many small heads.
    if isinstance(pred, (list, tuple)):
        dr_loss = jnp.float32(0.0)
        for p, l in zip(pred, label):
            dr_loss = dr_loss + _dr(p, l)
    elif isinstance(pred, dict):
        dr_loss = _mse(pred['int'], label[0])
        offset = 1
        if 'int_revert' in pred:
            dr_loss = dr_loss + _mse(pred['int_revert'], label[1])
            offset += 1
        for i in range(len(pred['dec'])):
            dr_loss = dr_loss + _dr(pred['dec'][i], label[i + offset])
    else:
        dr_loss = _dr(pred, label)

    return dr_loss + alpha * t_loss, dr_loss, t_loss


if __name__ == "__main__":
    key = jax.random.PRNGKey(0)
    k1, k2, k3 = jax.random.split(key, 3)

    b, n, c = 2, 8, 32           # feat: (batch, seq, hidden)
    feat = jax.random.normal(k1, (b, n, c), dtype=jnp.float32)
    pred = jax.random.normal(k2, (8, 128), dtype=jnp.float32)
    label = jax.random.normal(k3, (8, 128), dtype=jnp.float32)

    total, dr_loss, t_loss = loss_fun(pred, label, feat,
                                      alpha=1.0, margin=0.3,
                                      etf_head=False, loss_align=0)
    jax.block_until_ready((total, dr_loss, t_loss))
    print("KERNEL_OK")
</pallas_src>

<mosaic_0001>
module attributes {stable_mosaic.version = 11 : i64} {
  func.func @_triplet_kernel(%arg0: i32, %arg1: i32, %arg2: memref<8x32xbf16, #tpu.memory_space<vmem>>, %arg3: memref<32x16xbf16, #tpu.memory_space<vmem>>, %arg4: memref<8x1xf32, #tpu.memory_space<vmem>>, %arg5: memref<1x16xf32, #tpu.memory_space<vmem>>, %arg6: memref<8x1xf32, #tpu.memory_space<vmem>>, %arg7: memref<1x16xf32, #tpu.memory_space<vmem>>, %arg8: memref<1x16xf32, #tpu.memory_space<vmem>>, %arg9: memref<8x1xf32, #tpu.memory_space<vmem>>, %arg10: memref<8x1xf32, #tpu.memory_space<vmem>>, %arg11: memref<8x1xf32, #tpu.memory_space<vmem>>) attributes {dimension_semantics = [#tpu.dimension_semantics<parallel>, #tpu.dimension_semantics<arbitrary>], iteration_bounds = array<i64: 2, 1>, scalar_prefetch = 0 : i64, scratch_operands = 2 : i64, tpu.core_type = #tpu.core_type<tc>, window_params = [{transform_indices = @transform_0, window_bounds = array<i64: 8, 32>}, {transform_indices = @transform_1, window_bounds = array<i64: 32, 16>}, {transform_indices = @transform_2, window_bounds = array<i64: 8, 1>}, {transform_indices = @transform_3, window_bounds = array<i64: 1, 16>}, {transform_indices = @transform_4, window_bounds = array<i64: 8, 1>}, {transform_indices = @transform_5, window_bounds = array<i64: 1, 16>}, {transform_indices = @transform_6, window_bounds = array<i64: 1, 16>}, {transform_indices = @transform_7, window_bounds = array<i64: 8, 1>}]} {
    %c0_i32 = arith.constant 0 : i32
    %0 = arith.cmpi eq, %arg1, %c0_i32 : i32
    %1 = arith.extui %0 : i1 to i32
    %c0_i32_0 = arith.constant 0 : i32
    %2 = arith.cmpi ne, %1, %c0_i32_0 : i32
    scf.if %2 {
      %cst_32 = arith.constant 0.000000e+00 : f32
      %53 = vector.broadcast %cst_32 : f32 to vector<8x1xf32>
      %c0_33 = arith.constant 0 : index
      %c0_34 = arith.constant 0 : index
      %54 = vector.load %arg10[%c0_33, %c0_34] : memref<8x1xf32, #tpu.memory_space<vmem>>, vector<8x1xf32>
      tpu.vector_store %arg10[%c0_33, %c0_34], %53 {strides = array<i32>} : memref<8x1xf32, #tpu.memory_space<vmem>>, vector<8x1xf32>,
      %cst_35 = arith.constant 1.000000e+30 : f32
      %55 = vector.broadcast %cst_35 : f32 to vector<8x1xf32>
      %c0_36 = arith.constant 0 : index
      %c0_37 = arith.constant 0 : index
      %56 = vector.load %arg11[%c0_36, %c0_37] : memref<8x1xf32, #tpu.memory_space<vmem>>, vector<8x1xf32>
      tpu.vector_store %arg11[%c0_36, %c0_37], %55 {strides = array<i32>} : memref<8x1xf32, #tpu.memory_space<vmem>>, vector<8x1xf32>,
    } else {
    }
    %c0 = arith.constant 0 : index
    %c0_1 = arith.constant 0 : index
    %3 = vector.load %arg2[%c0, %c0_1] : memref<8x32xbf16, #tpu.memory_space<vmem>>, vector<8x32xbf16>
    %c0_2 = arith.constant 0 : index
    %c0_3 = arith.constant 0 : index
    %4 = vector.load %arg3[%c0_2, %c0_3] : memref<32x16xbf16, #tpu.memory_space<vmem>>, vector<32x16xbf16>
    %cst = arith.constant dense<0.000000e+00> : vector<8x16xf32>
    %5 = tpu.matmul %3, %4, %cst {dimension_numbers = #tpu.dot_dimension_numbers<[1], [0], [0], [1], [0, 0, 1, 1], [], []>} : vector<8x32xbf16>, vector<32x16xbf16>, vector<8x16xf32> -> vector<8x16xf32>
    %c0_4 = arith.constant 0 : index
    %c0_5 = arith.constant 0 : index
    %6 = vector.load %arg4[%c0_4, %c0_5] : memref<8x1xf32, #tpu.memory_space<vmem>>, vector<8x1xf32>
    %cst_6 = arith.constant 2.000000e+00 : f32
    %7 = vector.broadcast %cst_6 : f32 to vector<8x16xf32>
    %8 = arith.mulf %7, %5 : vector<8x16xf32>
    %9 = vector.broadcast %6 : vector<8x1xf32> to vector<8x16xf32>
    %10 = arith.subf %9, %8 : vector<8x16xf32>
    %c0_7 = arith.constant 0 : index
    %c0_8 = arith.constant 0 : index
    %11 = vector.load %arg5[%c0_7, %c0_8] : memref<1x16xf32, #tpu.memory_space<vmem>>, vector<1x16xf32>
    %12 = vector.broadcast %11 : vector<1x16xf32> to vector<8x16xf32>
    %13 = arith.addf %10, %12 : vector<8x16xf32>
    %cst_9 = arith.constant 0.000000e+00 : f32
    %14 = vector.broadcast %cst_9 : f32 to vector<8x16xf32>
    %15 = arith.maximumf %13, %14 : vector<8x16xf32>
    %c0_10 = arith.constant 0 : index
    %c0_11 = arith.constant 0 : index
    %16 = vector.load %arg6[%c0_10, %c0_11] : memref<8x1xf32, #tpu.memory_space<vmem>>, vector<8x1xf32>
    %c0_12 = arith.constant 0 : index
    %c0_13 = arith.constant 0 : index
    %17 = vector.load %arg7[%c0_12, %c0_13] : memref<1x16xf32, #tpu.memory_space<vmem>>, vector<1x16xf32>
    %18 = vector.broadcast %16 : vector<8x1xf32> to vector<8x16xf32>
    %19 = vector.broadcast %17 : vector<1x16xf32> to vector<8x16xf32>
    %20 = arith.cmpf oeq, %18, %19 : vector<8x16xf32>
    %c0_14 = arith.constant 0 : index
    %c0_15 = arith.constant 0 : index
    %21 = vector.load %arg8[%c0_14, %c0_15] : memref<1x16xf32, #tpu.memory_space<vmem>>, vector<1x16xf32>
    %cst_16 = arith.constant 5.000000e-01 : f32
    %22 = vector.broadcast %cst_16 : f32 to vector<1x16xf32>
    %23 = arith.cmpf ogt, %21, %22 : vector<1x16xf32>
    %cst_17 = arith.constant 0.000000e+00 : f32
    %24 = vector.broadcast %cst_17 : f32 to vector<8x16xf32>
    %25 = arith.select %20, %15, %24 : vector<8x16xi1>, vector<8x16xf32>
    %cst_18 = arith.constant dense<true> : vector<8x16xi1>
    %26 = arith.xori %20, %cst_18 : vector<8x16xi1>
    %27 = vector.broadcast %23 : vector<1x16xi1> to vector<8x16xi1>
    %28 = arith.andi %26, %27 : vector<8x16xi1>
    %cst_19 = arith.constant 1.000000e+30 : f32
    %29 = vector.broadcast %cst_19 : f32 to vector<8x16xf32>
    %30 = arith.select %28, %15, %29 : vector<8x16xi1>, vector<8x16xf32>
    %c0_20 = arith.constant 0 : index
    %c0_21 = arith.constant 0 : index
    %31 = vector.load %arg11[%c0_20, %c0_21] : memref<8x1xf32, #tpu.memory_space<vmem>>, vector<8x1xf32>
    %cst_22 = arith.constant dense<0x7F800000> : vector<8xf32>
    %32 = vector.multi_reduction <minimumf>, %30, %cst_22 [1] : vector<8x16xf32> to vector<8xf32>
    %33 = vector.shape_cast %32 : vector<8xf32> to vector<8x1xf32>
    %34 = arith.minimumf %31, %33 : vector<8x1xf32>
    %c0_23 = arith.constant 0 : index
    %c0_24 = arith.constant 0 : index
    %35 = vector.load %arg11[%c0_23, %c0_24] : memref<8x1xf32, #tpu.memory_space<vmem>>, vector<8x1xf32>
    tpu.vector_store %arg11[%c0_23, %c0_24], %34 {strides = array<i32>} : memref<8x1xf32, #tpu.memory_space<vmem>>, vector<8x1xf32>,
    %c16_i32 = arith.constant 16 : i32
    %36 = arith.muli %arg1, %c16_i32 : i32
    %c1_i32 = arith.constant 1 : i32
    %37 = arith.addi %arg0, %c1_i32 : i32
    %c8_i32 = arith.constant 8 : i32
    %38 = arith.muli %37, %c8_i32 : i32
    %39 = arith.cmpi slt, %36, %38 : i32
    %c8_i32_25 = arith.constant 8 : i32
    %40 = arith.muli %arg0, %c8_i32_25 : i32
    %c1_i32_26 = arith.constant 1 : i32
    %41 = arith.addi %arg1, %c1_i32_26 : i32
    %c16_i32_27 = arith.constant 16 : i32
    %42 = arith.muli %41, %c16_i32_27 : i32
    %43 = arith.cmpi slt, %40, %42 : i32
    %44 = arith.andi %39, %43 : i1
    %45 = arith.extui %44 : i1 to i32
    %c0_i32_28 = arith.constant 0 : i32
    %46 = arith.cmpi ne, %45, %c0_i32_28 : i32
    scf.if %46 {
      %c8_i32_32 = arith.constant 8 : i32
      %53 = arith.muli %arg0, %c8_i32_32 : i32
      %54 = tpu.iota {dimensions = array<i32: 0>} : vector<8x16xi32>
      %55 = vector.broadcast %53 : i32 to vector<8x16xi32>
      %56 = arith.addi %55, %54 : vector<8x16xi32>
      %c16_i32_33 = arith.constant 16 : i32
      %57 = arith.muli %arg1, %c16_i32_33 : i32
      %58 = tpu.iota {dimensions = array<i32: 1>} : vector<8x16xi32>
      %59 = vector.broadcast %57 : i32 to vector<8x16xi32>
      %60 = arith.addi %59, %58 : vector<8x16xi32>
      %61 = arith.cmpi ne, %56, %60 : vector<8x16xi32>
      %cst_34 = arith.constant 0.000000e+00 : f32
      %62 = vector.broadcast %cst_34 : f32 to vector<8x16xf32>
      %63 = arith.select %61, %25, %62 : vector<8x16xi1>, vector<8x16xf32>
      %c0_35 = arith.constant 0 : index
      %c0_36 = arith.constant 0 : index
      %64 = vector.load %arg10[%c0_35, %c0_36] : memref<8x1xf32, #tpu.memory_space<vmem>>, vector<8x1xf32>
      %cst_37 = arith.constant dense<0xFF800000> : vector<8xf32>
      %65 = vector.multi_reduction <maximumf>, %63, %cst_37 [1] : vector<8x16xf32> to vector<8xf32>
      %66 = vector.shape_cast %65 : vector<8xf32> to vector<8x1xf32>
      %67 = arith.maximumf %64, %66 : vector<8x1xf32>
      %c0_38 = arith.constant 0 : index
      %c0_39 = arith.constant 0 : index
      %68 = vector.load %arg10[%c0_38, %c0_39] : memref<8x1xf32, #tpu.memory_space<vmem>>, vector<8x1xf32>
      tpu.vector_store %arg10[%c0_38, %c0_39], %67 {strides = array<i32>} : memref<8x1xf32, #tpu.memory_space<vmem>>, vector<8x1xf32>,
    } else {
    }
    %true = arith.constant true
    %47 = arith.xori %44, %true : i1
    %48 = arith.extui %47 : i1 to i32
    %c0_i32_29 = arith.constant 0 : i32
    %49 = arith.cmpi ne, %48, %c0_i32_29 : i32
    scf.if %49 {
      %c0_32 = arith.constant 0 : index
      %c0_33 = arith.constant 0 : index
      %53 = vector.load %arg10[%c0_32, %c0_33] : memref<8x1xf32, #tpu.memory_space<vmem>>, vector<8x1xf32>
      %cst_34 = arith.constant dense<0xFF800000> : vector<8xf32>
      %54 = vector.multi_reduction <maximumf>, %25, %cst_34 [1] : vector<8x16xf32> to vector<8xf32>
      %55 = vector.shape_cast %54 : vector<8xf32> to vector<8x1xf32>
      %56 = arith.maximumf %53, %55 : vector<8x1xf32>
      %c0_35 = arith.constant 0 : index
      %c0_36 = arith.constant 0 : index
      %57 = vector.load %arg10[%c0_35, %c0_36] : memref<8x1xf32, #tpu.memory_space<vmem>>, vector<8x1xf32>
      tpu.vector_store %arg10[%c0_35, %c0_36], %56 {strides = array<i32>} : memref<8x1xf32, #tpu.memory_space<vmem>>, vector<8x1xf32>,
    } else {
    }
    %c0_i32_30 = arith.constant 0 : i32
    %50 = arith.cmpi eq, %arg1, %c0_i32_30 : i32
    %51 = arith.extui %50 : i1 to i32
    %c0_i32_31 = arith.constant 0 : i32
    %52 = arith.cmpi ne, %51, %c0_i32_31 : i32
    scf.if %52 {
      %c0_32 = arith.constant 0 : index
      %c0_33 = arith.constant 0 : index
      %53 = vector.load %arg10[%c0_32, %c0_33] : memref<8x1xf32, #tpu.memory_space<vmem>>, vector<8x1xf32>
      %54 = math.sqrt %53 : vector<8x1xf32>
      %c0_34 = arith.constant 0 : index
      %c0_35 = arith.constant 0 : index
      %55 = vector.load %arg11[%c0_34, %c0_35] : memref<8x1xf32, #tpu.memory_space<vmem>>, vector<8x1xf32>
      %56 = math.sqrt %55 : vector<8x1xf32>
      %57 = arith.subf %54, %56 : vector<8x1xf32>
      %cst_36 = arith.constant 3.000000e-01 : f32
      %58 = vector.broadcast %cst_36 : f32 to vector<8x1xf32>
      %59 = arith.addf %57, %58 : vector<8x1xf32>
      %cst_37 = arith.constant 0.000000e+00 : f32
      %60 = vector.broadcast %cst_37 : f32 to vector<8x1xf32>
      %61 = arith.maximumf %59, %60 : vector<8x1xf32>
      %c0_38 = arith.constant 0 : index
      %c0_39 = arith.constant 0 : index
      %62 = vector.load %arg9[%c0_38, %c0_39] : memref<8x1xf32, #tpu.memory_space<vmem>>, vector<8x1xf32>
      tpu.vector_store %arg9[%c0_38, %c0_39], %61 {strides = array<i32>} : memref<8x1xf32, #tpu.memory_space<vmem>>, vector<8x1xf32>,
    } else {
    }
    return
  }
  func.func @transform_0(%arg0: i32, %arg1: i32) -> (i32, i32) {
    %c0_i32 = arith.constant 0 : i32
    %c0_i32_0 = arith.constant 0 : i32
    return %arg0, %c0_i32 : i32, i32
  }
  func.func @transform_1(%arg0: i32, %arg1: i32) -> (i32, i32) {
    %c0_i32 = arith.constant 0 : i32
    %c0_i32_0 = arith.constant 0 : i32
    return %c0_i32, %arg1 : i32, i32
  }
  func.func @transform_2(%arg0: i32, %arg1: i32) -> (i32, i32) {
    %c0_i32 = arith.constant 0 : i32
    %c0_i32_0 = arith.constant 0 : i32
    return %arg0, %c0_i32 : i32, i32
  }
  func.func @transform_3(%arg0: i32, %arg1: i32) -> (i32, i32) {
    %c0_i32 = arith.constant 0 : i32
    %c0_i32_0 = arith.constant 0 : i32
    return %c0_i32, %arg1 : i32, i32
  }
  func.func @transform_4(%arg0: i32, %arg1: i32) -> (i32, i32) {
    %c0_i32 = arith.constant 0 : i32
    %c0_i32_0 = arith.constant 0 : i32
    return %arg0, %c0_i32 : i32, i32
  }
  func.func @transform_5(%arg0: i32, %arg1: i32) -> (i32, i32) {
    %c0_i32 = arith.constant 0 : i32
    %c0_i32_0 = arith.constant 0 : i32
    return %c0_i32, %arg1 : i32, i32
  }
  func.func @transform_6(%arg0: i32, %arg1: i32) -> (i32, i32) {
    %c0_i32 = arith.constant 0 : i32
    %c0_i32_0 = arith.constant 0 : i32
    return %c0_i32, %arg1 : i32, i32
  }
  func.func @transform_7(%arg0: i32, %arg1: i32) -> (i32, i32) {
    %c0_i32 = arith.constant 0 : i32
    %c0_i32_0 = arith.constant 0 : i32
    return %arg0, %c0_i32 : i32, i32
  }
}

</mosaic_0001>

<bundles_post_ra>
// kernel: tpu_custom_call.1
= control target key start
LH: loop header
LB: loop body
LE: loop exit
PB: predicated region body
PF: predicated region fallthrough
CT: control target
= control target key end

     0   :  { %s837_s24 = smov 0   ;;  %s839_s25 = smov 0   ;;  %s923_s0 = inlined_call_operand.vmem [shape: bf16[16,32], index: 0, kind: input, shape index: {}]   ;;  %s924_s1 = inlined_call_operand.vmem [shape: bf16[32,16], index: 1, kind: input, shape index: {}]   ;;  %s925_s2 = inlined_call_operand.vmem [shape: f32[16,1], index: 2, kind: input, shape index: {}]   ;;  %s926_s3 = inlined_call_operand.vmem [shape: f32[1,16], index: 3, kind: input, shape index: {}]   ;;  %s927_s4 = inlined_call_operand.vmem [shape: f32[16,1], index: 4, kind: input, shape index: {}]   ;;  %s928_s5 = inlined_call_operand.vmem [shape: f32[1,16], index: 5, kind: input, shape index: {}]   ;;  %s929_s6 = inlined_call_operand.vmem [shape: f32[1,16], index: 6, kind: input, shape index: {}]   ;;  %s930_s7 = inlined_call_operand.vmem [shape: f32[16,1], index: 7, kind: output, shape index: {}]  }
   0x1   :  { %s841_s26 = smov 0  }
   0x2 LB: > { %s29_s27 = sadd.s32 1, %s786_s25  ;;  %p704_p0 = scmp.ge.s32.totalorder %s790_s26, 1  ;;  %s790_s26 = sphi %s841_s26, %s17_s26   ;;  %s786_s25 = sphi %s839_s25, %s933_s25   ;;  %s782_s24 = sphi %s837_s24, %s932_s24  }
   0x3   : > { %p31_p1 = scmp.ge.s32.totalorder %s29_s27, 2  ;;  %p299_p2 = scmp.lt.s32.totalorder %s790_s26, 3 }
   0x5   : > { %s935_s27 = smov (%p31_p1, %s29_s27), 0  ;;  %p300_p3 = pnand %p704_p0, %p299_p2 }
   0x6   : > { %vm384_vm0 = vcmask (!%p300_p3), 7168   ;;  %v792_v0 = vmov (!%p300_p3), 0.0   ;;  %v762_v1 = vld [vmem:[%s924_s1] sm:$0xff] (!%p300_p3)   ;;  %vm793_vm1 = vmmov (!%p300_p3), 0   ;;  %p350_p4 = scmp.lt.s32.totalorder (!%p300_p3), %s782_s24, 1  ;;  %v763_v2 = vld [vmem:[%s924_s1 + $0x8] sm:$0xff] (!%p300_p3)   ;;  %v484_v8 = vlaneseq (!%p300_p3) }
   0x7   : > { %303 = sbr.rel (%p300_p3) target bundleno = 563 (0x233), region = 48  ;;  %385 = vst.msk [vmem:[#allocation2] sm:$0xff] (!%p300_p3), %vm384_vm0, %v792_v0  ;;  %724 = vmatprep.subr.bf16.mxu0 (!%p300_p3), %v792_v0  ;;  %728 = vmatprep.mubr.msk.bf16.mxu0 (!%p300_p3), %vm793_vm1, %v792_v0  ;;  %v794_v3 = vmov (!%p300_p3), 0   ;;  %vm404_vm2 = vcmask (!%p300_p3), 261120   ;;  %v795_v7 = vmov (!%p300_p3), 1e+30  }
   0x8   : > { %725 = vmatpush3.bf16.msra.mxu0 (!%p300_p3), %v762_v1  ;;  %761 = vset.pattern.permute.xlu0 (!%p300_p3), %v794_v3  ;;  %386 = vst.msk [vmem:[#allocation3] sm:$0xff] (!%p300_p3), %vm384_vm0, %v795_v7  ;;  %v479_v9 = vld [vmem:[%s929_s6] sm:$0x1] (!%p300_p3)  ;;  %v485_v10 = vshrl.u32 (!%p300_p3), %v484_v8, 7  ;;  %vm796_vm5 = vmmov (!%p300_p3), 1   ;;  %vm492_vm8 = vcmask (!%p300_p3), 130048  }
   0x9   : > { %726 = vmatprep.subr.bf16.mxu0 (!%p300_p3), %v792_v0  ;;  %vm480_vm3 = vcmp.gt.f32.partialorder (!%p300_p3), %v479_v9, 0.5  ;;  %v713_v14 = vld [vmem:[%s928_s5] ss:$0 sm:$0xff] (!%p300_p3)  ;;  %s719_s12 = sshll.u32 (!%p300_p3), %s782_s24, 3 }
   0xa   : > { %v486_v12 = vsub.s32 (!%p300_p3), 0, %v485_v10  ;;  %v483_v13 = vsel (!%p300_p3), %vm480_vm3, 1, %v794_v3  ;;  %v712_v20 = vld [vmem:[%s926_s3] ss:$0 sm:$0xff] (!%p300_p3)  ;;  %s720_s13 = sadd.s32 (!%p300_p3), 8, %s719_s12  ;;  %p506_p6 = scmp.lt.s32.totalorder (!%p300_p3), %s719_s12, 16 }
   0xb   : > { %p715_p5 = scmp.gt.s32.totalorder (!%p300_p3), %s720_s13, 0 }
   0xc   : > { %727 = vmatpush3.bf16.msra.mxu0 (!%p300_p3), %v763_v2  ;;  %v487_v17 = vrot.slane (!%p300_p3), %v483_v13, %v486_v12 }
   0xd   : > { %p895_p7 = pnand (!%p300_p3), %p715_p5, %p506_p6 }
   0xe   : > { %s351_s9 = scalar_select %p350_p4, %s782_s24, 1  ;;  %vm488_vm7 = vcmp.eq.s32.totalorder %v487_v17, 1 }
   0xf   : > { %v491_v29 = vld [vmem:[#allocation3] sm:$0xff]  ;;  %v513_v32 = vstv (!%p895_p7), %s719_s12  ;;  %v516_v33 = vand.u32 (!%p895_p7), 127, %v484_v8  ;;  %v521_v37 = vld [vmem:[#allocation2] sm:$0xff] (!%p895_p7) }
  0x10   : > { %s705_s10 = sshll.u32 %s351_s9, 2  ;;  %s866_s11 = sshll.u32 %s351_s9, 3  ;;  %v514_v34 = vadd.s32 (!%p895_p7), %v513_v32, %v485_v10 }
  0x11   : > { %s353_s14 = scalar_lea.vmem %s923_s0, %s705_s10  ;;  %s361_s17 = scalar_lea.vmem %s925_s2, %s866_s11 }
  0x12   : > { %v387_v4 = vld [vmem:[%s353_s14] sm:$0xf]  ;;  %s378_s20 = scalar_lea.vmem %s930_s7, %s866_s11  ;;  %s368_s23 = scalar_lea.vmem %s927_s4, %s866_s11  ;;  %vm519_vm10 = vcmp.ne.s32.totalorder (!%p895_p7), %v514_v34, %v516_v33 }
  0x13   : > { %v448_v5 = vld [vmem:[%s361_s17] sm:$0xff]  ;;  %729 = vmatmul.mubr.msk.bf16.vlgmr.msra.gmra.mrb[0].mxu0 %vm404_vm2, %v387_v4 }
  0x14   : > { %452 = vperm.xlu0 %761, %v448_v5   ;;  %v465_v6 = vld [vmem:[%s368_s23] sm:$0xff] }
  0x18   : > { %469 = vperm.xlu0 %761, %v465_v6  }
  0x93   : > { %v453_v11 = vpop.permute.xlu0 %452 }
  0x97   : > { %v470_v15 = vpop.permute.xlu0 %469 }
  0x98   : > { %vm478_vm4 = vcmp.eq.f32.partialorder %v470_v15, %v713_v14 }
  0x99   : > { %vm482_vm6 = vmxor %vm478_vm4, %vm796_vm5 }
  0x9a   : > { %vm489_vm9 = vmand %vm482_vm6, %vm488_vm7 }
  0xe6   : > { %v442_v16 = vpop.f32.mrb[0].mxu0 }
  0xe7   : > { %v449_v18 = vmul.f32 2.0, %v442_v16  ;;  %v730_v19 = vpop.f32.mrb[1].mxu0 }
  0xe8   : > { %v445_v21 = vpop.f32.mrb[2].mxu0 }
  0xe9   : > { %v455_v22 = vsub.f32 %v453_v11, %v449_v18  ;;  %v731_v23 = vpop.f32.mrb[3].mxu0 }
  0xeb   : > { %v463_v24 = vadd.f32 %v712_v20, %v455_v22 }
  0xed   : > { %v464_v25 = vmax.f32 %v463_v24, 0.0 }
  0xef   : > { %v481_v26 = vsel %vm478_vm4, %v464_v25, 0.0  ;;  %v490_v27 = vsel %vm489_vm9, %v464_v25, 1e+30 }
  0xf0   : > { %v493_v28 = vsel %vm492_vm8, %v490_v27, inf  ;;  %v520_v35 = vsel (!%p895_p7), %vm519_vm10, %v481_v26, 0.0 }
  0xf1   : > { %494 = vmin.xlane.f32.xlu1 %v493_v28  ;;  %v522_v36 = vsel (!%p895_p7), %vm492_vm8, %v520_v35, -inf }
  0xf2   : > { %523 = vmax.xlane.f32.xlu0 (!%p895_p7), %v522_v36 }
 0x17b   : > { %510 = sbr.rel (%p895_p7) target bundleno = 387 (0x183), region = 56 }
 0x17e   : > { %v495_v30 = vpop.xlane.xlu1 %494 }
 0x17f   : > { %v496_v31 = vmin.f32 %v491_v29, %v495_v30  ;;  %v524_v38 = vpop.xlane.xlu0 (!%p895_p7), %523 }
 0x180   : > { %v525_v39 = vmax.f32 (!%p895_p7), %v521_v37, %v524_v38 }
 0x181   : > { %498 = vst.msk [vmem:[#allocation3] sm:$0xff] %vm384_vm0, %v496_v31 }
 0x182   : > { %526 = vst.msk [vmem:[#allocation2] sm:$0xff] %vm384_vm0, %v525_v39 }
 0x183 PF: > { %529 = sbr.rel (!%p895_p7) target bundleno = 533 (0x215), region = 60  ;;  %v531_v40 = vsel (%p895_p7), %vm492_vm8, %v481_v26, -inf }
 0x184   : > { %532 = vmax.xlane.f32.xlu0 (%p895_p7), %v531_v40 }
 0x189   : > { %v530_v41 = vld [vmem:[#allocation2] sm:$0xff] (%p895_p7) }
 0x211   : > { %v533_v42 = vpop.xlane.xlu0 %532 }
 0x212   : > { %v534_v43 = vmax.f32 %v530_v41, %v533_v42 }
 0x214   : > { %535 = vst.msk [vmem:[#allocation2] sm:$0xff] %vm384_vm0, %v534_v43 }
 0x215 PF: > { %v547_v45 = vld [vmem:[#allocation3] sm:$0xff] }
 0x216   : > { %vm550_vm13 = vcmp.eq.f32.partialorder %v547_v45, inf  ;;  %v553_v50 = vand.u32 2147483648, %v547_v45  ;;  %vm552_vm14 = vcmp.eq.f32.partialorder %v547_v45, 0.0 }
 0x21b   : > { %v539_v44 = vld [vmem:[#allocation2] sm:$0xff] }
 0x21c   : > { %764 = vrsqrt.f32 %v539_v44  ;;  %vm542_vm11 = vcmp.eq.f32.partialorder %v539_v44, inf  ;;  %v545_v47 = vand.u32 2147483648, %v539_v44  ;;  %vm544_vm12 = vcmp.eq.f32.partialorder %v539_v44, 0.0 }
 0x21d   : > { %766 = vrsqrt.f32 %v547_v45 }
 0x226   : > { %v765_v46 = vpop.eup %764 }
 0x227   : > { %v767_v48 = vpop.eup %766  ;;  %v541_v49 = vmul.f32 %v765_v46, %v539_v44 }
 0x228   : > { %v549_v51 = vmul.f32 %v767_v48, %v547_v45 }
 0x229   : > { %v543_v52 = vsel %vm542_vm11, %v539_v44, %v541_v49 }
 0x22a   : > { %v546_v53 = vsel %vm544_vm12, %v545_v47, %v543_v52  ;;  %v551_v54 = vsel %vm550_vm13, %v547_v45, %v549_v51 }
 0x22b   : > { %v554_v55 = vsel %vm552_vm14, %v553_v50, %v551_v54 }
 0x22c   : > { %v555_v56 = vsub.f32 %v546_v53, %v554_v55 }
 0x22e   : > { %v556_v57 = vadd.f32 0.3, %v555_v56 }
 0x230   : > { %v557_v58 = vmax.f32 %v556_v57, 0.0 }
 0x232   : > { %558 = vst.msk [vmem:[%s378_s20] sm:$0xff] %vm384_vm0, %v557_v58 }
 0x233 PF: > { %s17_s26 = sadd.s32 1, %s790_s26   ;;  %s932_s24 = smov %s786_s25 }
 0x234   : > { %p14_p8 = scmp.ge.s32.totalorder %s17_s26, 4   ;;  %s933_s25 = smov %s935_s27 }
 0x236   :  { %16 = sbr.rel (!%p14_p8) target bundleno = 2 (0x2), region = 112 }

</bundles_post_ra>
